<compile_context>
chip_gen: v7x
topology: tpu7x:2x2x1
jax: 0.10.0
libtpu: 0.0.40
codegen_flags: <defaults>
</compile_context>

<pallas_src>
import numpy as np
import jax
import jax.numpy as jnp
from jax.experimental import pallas as pl
from jax.experimental.pallas import tpu as pltpu

_BF16 = jnp.bfloat16

_VMEM_LIMIT_CACHE = None


def _vmem_limit():
    """Scoped-VMEM limit: above the 16/32 MiB defaults, below physical VMEM."""
    global _VMEM_LIMIT_CACHE
    if _VMEM_LIMIT_CACHE is None:
        try:
            cap = int(pltpu.get_tpu_info().vmem_capacity_bytes)
            lim = min(cap - 16 * 1024 * 1024, 64 * 1024 * 1024)
        except Exception:
            lim = 48 * 1024 * 1024       # safe on v5e/v6e/v7x
        _VMEM_LIMIT_CACHE = max(lim, 32 * 1024 * 1024)
    return _VMEM_LIMIT_CACHE


# ----------------------------------------------------------------------------
# Kernels
# ----------------------------------------------------------------------------
def _conv1x1_kernel(x_ref, w_ref, b_ref, o_ref):
    # x:(Cin, m) f32  w:(Cout, Cin) bf16  b:(Cout, 1) f32  ->  o:(Cout, m) bf16
    x = x_ref[...].astype(_BF16)
    y = jnp.dot(w_ref[...], x, preferred_element_type=jnp.float32) + b_ref[...]
    o_ref[...] = y.astype(o_ref.dtype)


def _conv1x1_resize_kernel(x_ref, mwt_ref, a_ref, b_ref, o_ref):
    # Fused 1x1 conv + separable bilinear resize (align_corners=False):
    #   x:(Cin*H, W) f32, mwt:(W, Wt) bf16, a = kron(W1, Mh):(Cout*Ht, Cin*H) bf16,
    #   b:(Cout*Ht, 1) f32  ->  o:(Cout*Ht, Wt) bf16
    xw = jnp.dot(x_ref[...].astype(_BF16), mwt_ref[...],
                 preferred_element_type=jnp.float32)            # width pass
    out = jnp.dot(a_ref[...], xw.astype(_BF16),
                  preferred_element_type=jnp.float32) + b_ref[...]
    o_ref[...] = out.astype(o_ref.dtype)


def _lane_shift(u, off):
    """s[:, p] = u[:, (p + off) mod M]; wrapped lanes are masked by the caller."""
    # TODO(synk): switch to pltpu.roll (XLU rotate slot) once its rotation
    #             direction is verified on the target jax version.
    m = u.shape[-1]
    s = off % m
    if s == 0:
        return u
    return jnp.concatenate([u[:, s:], u[:, :s]], axis=1)


def _make_fusion_kernel(num_levels, c_each, H, W):
    """3x3 'same' conv over the (virtual) channel-concat of `num_levels` inputs."""
    cin_tot = num_levels * c_each
    M = H * W

    def kernel(*refs):
        u_refs = refs[:num_levels]                 # each (c_each, M) bf16
        wf_ref = refs[num_levels]                  # (Cout, 9*cin_tot) bf16
        b_ref = refs[num_levels + 1]               # (Cout, 1) f32
        o_ref = refs[num_levels + 2]               # (Cout, M) f32
        patches_ref = refs[num_levels + 3]         # VMEM scratch (9*cin_tot, M) bf16

        lane = jax.lax.broadcasted_iota(jnp.int32, (1, M), 1)
        hh = lane // W
        ww = lane % W
        us = [r[...] for r in u_refs]              # load each level once (bf16)
        zeros = jnp.zeros((c_each, M), dtype=patches_ref.dtype)

        # im2col: for each of the 9 taps, shift along lanes and mask the
        # out-of-bounds (zero-padding) positions, writing into the bf16 slab.
        for dh in (-1, 0, 1):
            for dw in (-1, 0, 1):
                tap = (dh + 1) * 3 + (dw + 1)
                off = dh * W + dw
                # one mask per tap, pre-broadcast, reused across all levels
                valid = jnp.broadcast_to(
                    (hh + dh >= 0) & (hh + dh < H) &
                    (ww + dw >= 0) & (ww + dw < W), (c_each, M))
                for l, u in enumerate(us):
                    shifted = _lane_shift(u, off)
                    row = tap * cin_tot + l * c_each
                    patches_ref[row:row + c_each, :] = jnp.where(valid, shifted, zeros)

        # one deep-K matmul: (Cout, 9*cin_tot) @ (9*cin_tot, M), f32 accum
        acc = jnp.dot(wf_ref[...], patches_ref[...],
                      preferred_element_type=jnp.float32)
        o_ref[...] = (acc + b_ref[...]).astype(o_ref.dtype)

    return kernel


# ----------------------------------------------------------------------------
# pallas_call wrappers
# ----------------------------------------------------------------------------
def _pick_tile(m):
    # lane-axis tile: full array at toy sizes, 512-2048 tiles at realistic sizes
    for c in (2048, 1024, 512):
        if m >= c and m % c == 0:
            return c
    return m


def conv1x1(x, w_bf16, b):
    """x:(N, Cin, M) f32 -> (N, Cout, M) bf16; 1x1 conv as (Cout,Cin)@(Cin,M)."""
    # TODO(synk): fold batch onto the lane axis (Cin, N*HW) to cut grid steps.
    N, Cin, M = x.shape
    Cout = w_bf16.shape[0]
    bm = _pick_tile(M)
    return pl.pallas_call(
        _conv1x1_kernel,
        out_shape=jax.ShapeDtypeStruct((N, Cout, M), _BF16),
        grid=(N, M // bm),
        in_specs=[pl.BlockSpec((None, Cin, bm), lambda n, m: (n, 0, m)),
                  pl.BlockSpec((Cout, Cin), lambda n, m: (0, 0)),
                  pl.BlockSpec((Cout, 1), lambda n, m: (0, 0))],
        out_specs=pl.BlockSpec((None, Cout, bm), lambda n, m: (n, 0, m)),
        compiler_params=pltpu.CompilerParams(
            dimension_semantics=("parallel", "parallel"),
            vmem_limit_bytes=_vmem_limit()),
    )(x, w_bf16, b.reshape(Cout, 1))


def conv1x1_resize(feat_nchw, w, b, Ht, Wt):
    """Fused 1x1 conv + separable bilinear resize.

    feat:(N, Cin, H, W) f32, w:(Cout, Cin), b:(Cout,) -> (N, Cout, Ht*Wt) bf16.
    """
    N, Cin, H, W = feat_nchw.shape
    Cout = w.shape[0]
    x2 = feat_nchw.reshape(N, Cin * H, W)                   # free row-major reshape

    mwT = jnp.asarray(bilinear_matrix(Wt, W).T).astype(_BF16)        # (W, Wt)
    mh = jnp.asarray(bilinear_matrix(Ht, H))                         # (Ht, H)
    # kron(W1, Mh): A[co*Ht+ho, ci*H+h] = W1[co,ci] * Mh[ho,h]
    a = (w[:, None, :, None] * mh[None, :, None, :]).reshape(
        Cout * Ht, Cin * H).astype(_BF16)
    b_rep = jnp.repeat(b, Ht).reshape(Cout * Ht, 1)                  # f32

    out = pl.pallas_call(
        _conv1x1_resize_kernel,
        out_shape=jax.ShapeDtypeStruct((N, Cout * Ht, Wt), _BF16),
        grid=(N,),
        in_specs=[pl.BlockSpec((None, Cin * H, W), lambda n: (n, 0, 0)),
                  pl.BlockSpec((W, Wt), lambda n: (0, 0)),
                  pl.BlockSpec((Cout * Ht, Cin * H), lambda n: (0, 0)),
                  pl.BlockSpec((Cout * Ht, 1), lambda n: (0, 0))],
        out_specs=pl.BlockSpec((None, Cout * Ht, Wt), lambda n: (n, 0, 0)),
        compiler_params=pltpu.CompilerParams(
            dimension_semantics=("parallel",),
            vmem_limit_bytes=_vmem_limit()),
    )(x2, mwT, a, b_rep)
    return out.reshape(N, Cout, Ht * Wt)                    # free row-major reshape


def fusion_conv3x3(ups, wf_flat_bf16, b, H, W):
    """3x3 'same' conv over the channel-concat of `ups`, WITHOUT an HBM concat."""
    N, c_each, M = ups[0].shape
    L = len(ups)
    Cout = wf_flat_bf16.shape[0]
    kernel = _make_fusion_kernel(L, c_each, H, W)
    in_specs = ([pl.BlockSpec((None, c_each, M), lambda n: (n, 0, 0))
                 for _ in range(L)]
                + [pl.BlockSpec(wf_flat_bf16.shape, lambda n: (0, 0)),
                   pl.BlockSpec((Cout, 1), lambda n: (0, 0))])
    # TODO(synk): for large H*W, tile the spatial lane axis with halo rows
    # (also unlocks the 2nd TensorCore on v7x via a parallel spatial grid axis).
    return pl.pallas_call(
        kernel,
        out_shape=jax.ShapeDtypeStruct((N, Cout, M), jnp.float32),
        grid=(N,),
        in_specs=in_specs,
        out_specs=pl.BlockSpec((None, Cout, M), lambda n: (n, 0, 0)),
        scratch_shapes=[pltpu.VMEM((9 * L * c_each, M), _BF16)],
        compiler_params=pltpu.CompilerParams(
            dimension_semantics=("parallel",),
            vmem_limit_bytes=_vmem_limit()),
    )(*ups, wf_flat_bf16, b.reshape(Cout, 1))


# ----------------------------------------------------------------------------
# Bilinear interpolation matrices (align_corners=False), host-precomputed
# ----------------------------------------------------------------------------
def bilinear_matrix(out_size, in_size):
    # Matches torch F.interpolate(mode='bilinear', align_corners=False).
    m = np.zeros((out_size, in_size), dtype=np.float32)
    if in_size == 1:
        m[:, 0] = 1.0
        return m
    scale = in_size / out_size
    for o in range(out_size):
        src = max((o + 0.5) * scale - 0.5, 0.0)
        i0 = min(int(np.floor(src)), in_size - 1)
        i1 = min(i0 + 1, in_size - 1)
        lam = src - i0
        m[o, i0] += 1.0 - lam
        m[o, i1] += lam
    return m


# ----------------------------------------------------------------------------
# MFF forward (Pallas) and parameter init
# ----------------------------------------------------------------------------
def init_params(in_channels_list, out_channels, key):
    params = {"convs": []}
    for cin in in_channels_list:
        key, k1, k2 = jax.random.split(key, 3)
        s = 1.0 / np.sqrt(cin)
        w = jax.random.uniform(k1, (out_channels, cin), jnp.float32, -s, s)
        b = jax.random.uniform(k2, (out_channels,), jnp.float32, -s, s)
        params["convs"].append((w, b))
    cin_f = len(in_channels_list) * out_channels
    key, k1, k2 = jax.random.split(key, 3)
    s = 1.0 / np.sqrt(cin_f * 9)
    params["fusion_w"] = jax.random.uniform(
        k1, (out_channels, cin_f, 3, 3), jnp.float32, -s, s)   # OIHW
    params["fusion_b"] = jax.random.uniform(
        k2, (out_channels,), jnp.float32, -s, s)
    return params


def mff_forward(features_nchw, params):
    """features: list of NCHW arrays (PyTorch convention). Returns NCHW."""
    N, _, Ht, Wt = features_nchw[0].shape
    Cout = params["convs"][0][0].shape[0]
    ups = []
    for i, feat in enumerate(features_nchw):
        _, Cin, H, W = feat.shape
        w, b = params["convs"][i]                  # (Cout, Cin), (Cout,)
        if (H, W) == (Ht, Wt):
            x = feat.reshape(N, Cin, H * W)        # free row-major reshape
            y = conv1x1(x, w.astype(_BF16), b)     # (N, Cout, Ht*Wt) bf16
        else:
            y = conv1x1_resize(feat, w, b, Ht, Wt)  # (N, Cout, Ht*Wt) bf16
        ups.append(y)
    # fusion weight OIHW (Cout, L*Cout, 3, 3) -> (Cout, 9*L*Cout) matching the
    # im2col row order (kh, kw, cin) used inside the fusion kernel; bf16 host-cast.
    wf = params["fusion_w"]
    wf_flat = jnp.transpose(wf, (0, 2, 3, 1)).reshape(Cout, -1).astype(_BF16)
    out = fusion_conv3x3(ups, wf_flat, params["fusion_b"], Ht, Wt)
    return out.reshape(N, Cout, Ht, Wt)            # already NCHW


# ----------------------------------------------------------------------------
# Pure-JAX reference (sanity check of the Pallas kernels)
# ----------------------------------------------------------------------------
def mff_reference(features_nchw, params):
    target_h, target_w = features_nchw[0].shape[2:]
    dn = ("NCHW", "OIHW", "NCHW")
    ups = []
    for i, feat in enumerate(features_nchw):
        w, b = params["convs"][i]
        y = jax.lax.conv_general_dilated(
            feat, w[:, :, None, None], (1, 1), "VALID", dimension_numbers=dn,
            precision=jax.lax.Precision.HIGHEST) + b.reshape(1, -1, 1, 1)
        H, W = y.shape[2:]
        if (H, W) != (target_h, target_w):
            Mh = jnp.asarray(bilinear_matrix(target_h, H))
            Mw = jnp.asarray(bilinear_matrix(target_w, W))
            y = jnp.einsum("oi,ncij,pj->ncop", Mh, y, Mw,
                           precision=jax.lax.Precision.HIGHEST)
        ups.append(y)
    cat = jnp.concatenate(ups, axis=1)
    out = jax.lax.conv_general_dilated(
        cat, params["fusion_w"], (1, 1), ((1, 1), (1, 1)), dimension_numbers=dn,
        precision=jax.lax.Precision.HIGHEST)
    return out + params["fusion_b"].reshape(1, -1, 1, 1)


# ----------------------------------------------------------------------------
if __name__ == "__main__":
    key = jax.random.PRNGKey(0)
    in_channels_list = [4, 8, 16]
    out_channels = 8

    key, kf0, kf1, kf2, kp = jax.random.split(key, 5)
    features = [
        jax.random.normal(kf0, (2, 4, 16, 16), jnp.float32),   # target 16x16
        jax.random.normal(kf1, (2, 8, 8, 8), jnp.float32),
        jax.random.normal(kf2, (2, 16, 4, 4), jnp.float32),
    ]
    params = init_params(in_channels_list, out_channels, kp)

    out = jax.block_until_ready(mff_forward(features, params))
    assert out.shape == (2, out_channels, 16, 16), out.shape

    ref = jax.block_until_ready(mff_reference(features, params))
    if not np.allclose(np.asarray(out), np.asarray(ref), rtol=2e-2, atol=2e-2):
        raise AssertionError(
            f"Pallas/JAX mismatch, max abs err = "
            f"{float(jnp.max(jnp.abs(out - ref)))}")

    print("KERNEL_OK")
</pallas_src>

<mosaic_0001>
module attributes {stable_mosaic.version = 11 : i64} {
  func.func @_conv1x1_kernel(%arg0: i32, %arg1: i32, %arg2: memref<1x4x256xf32, #tpu.memory_space<vmem>>, %arg3: memref<8x4xbf16, #tpu.memory_space<vmem>>, %arg4: memref<8x1xf32, #tpu.memory_space<vmem>>, %arg5: memref<1x8x256xbf16, #tpu.memory_space<vmem>>) attributes {dimension_semantics = [#tpu.dimension_semantics<parallel>, #tpu.dimension_semantics<parallel>], iteration_bounds = array<i64: 2, 1>, scalar_prefetch = 0 : i64, scratch_operands = 0 : i64, tpu.core_type = #tpu.core_type<tc>, window_params = [{transform_indices = @transform_0, window_bounds = array<i64: 1, 4, 256>}, {pipeline_mode = #tpu.pipeline_mode<synchronous>, transform_indices = @transform_1, window_bounds = array<i64: 8, 4>}, {pipeline_mode = #tpu.pipeline_mode<synchronous>, transform_indices = @transform_2, window_bounds = array<i64: 8, 1>}, {transform_indices = @transform_3, window_bounds = array<i64: 1, 8, 256>}]} {
    %c0 = arith.constant 0 : index
    %c0_0 = arith.constant 0 : index
    %c0_1 = arith.constant 0 : index
    %0 = vector.load %arg2[%c0, %c0_0, %c0_1] : memref<1x4x256xf32, #tpu.memory_space<vmem>>, vector<1x4x256xf32>
    %1 = vector.shape_cast %0 : vector<1x4x256xf32> to vector<4x256xf32>
    %2 = arith.truncf %1 : vector<4x256xf32> to vector<4x256xbf16>
    %c0_2 = arith.constant 0 : index
    %c0_3 = arith.constant 0 : index
    %3 = vector.load %arg3[%c0_2, %c0_3] : memref<8x4xbf16, #tpu.memory_space<vmem>>, vector<8x4xbf16>
    %cst = arith.constant dense<0.000000e+00> : vector<8x256xf32>
    %4 = tpu.matmul %3, %2, %cst {dimension_numbers = #tpu.dot_dimension_numbers<[1], [0], [0], [1], [0, 0, 1, 1], [], []>} : vector<8x4xbf16>, vector<4x256xbf16>, vector<8x256xf32> -> vector<8x256xf32>
    %c0_4 = arith.constant 0 : index
    %c0_5 = arith.constant 0 : index
    %5 = vector.load %arg4[%c0_4, %c0_5] : memref<8x1xf32, #tpu.memory_space<vmem>>, vector<8x1xf32>
    %6 = vector.broadcast %5 : vector<8x1xf32> to vector<8x256xf32>
    %7 = arith.addf %4, %6 : vector<8x256xf32>
    %8 = arith.truncf %7 : vector<8x256xf32> to vector<8x256xbf16>
    %c0_6 = arith.constant 0 : index
    %c0_7 = arith.constant 0 : index
    %c0_8 = arith.constant 0 : index
    %9 = vector.load %arg5[%c0_6, %c0_7, %c0_8] : memref<1x8x256xbf16, #tpu.memory_space<vmem>>, vector<1x8x256xbf16>
    %10 = vector.shape_cast %9 : vector<1x8x256xbf16> to vector<8x256xbf16>
    %11 = vector.shape_cast %8 : vector<8x256xbf16> to vector<1x8x256xbf16>
    tpu.vector_store %arg5[%c0_6, %c0_7, %c0_8], %11 {strides = array<i32>} : memref<1x8x256xbf16, #tpu.memory_space<vmem>>, vector<1x8x256xbf16>,
    return
  }
  func.func @transform_0(%arg0: i32, %arg1: i32) -> (i32, i32, i32) {
    %c0_i32 = arith.constant 0 : i32
    %c0_i32_0 = arith.constant 0 : i32
    return %arg0, %c0_i32, %arg1 : i32, i32, i32
  }
  func.func @transform_1(%arg0: i32, %arg1: i32) -> (i32, i32) {
    %c0_i32 = arith.constant 0 : i32
    %c0_i32_0 = arith.constant 0 : i32
    %c0_i32_1 = arith.constant 0 : i32
    return %c0_i32, %c0_i32_0 : i32, i32
  }
  func.func @transform_2(%arg0: i32, %arg1: i32) -> (i32, i32) {
    %c0_i32 = arith.constant 0 : i32
    %c0_i32_0 = arith.constant 0 : i32
    %c0_i32_1 = arith.constant 0 : i32
    return %c0_i32, %c0_i32_0 : i32, i32
  }
  func.func @transform_3(%arg0: i32, %arg1: i32) -> (i32, i32, i32) {
    %c0_i32 = arith.constant 0 : i32
    %c0_i32_0 = arith.constant 0 : i32
    return %arg0, %c0_i32, %arg1 : i32, i32, i32
  }
}

</mosaic_0001>

<bundles_post_ra>
// kernel: tpu_custom_call.1
= control target key start
LH: loop header
LB: loop body
LE: loop exit
PB: predicated region body
PF: predicated region fallthrough
CT: control target
= control target key end

     0   :  { %8 = vsyncpa [#allocation3], 0  ;;  %s784_s0 = inlined_call_operand.hbm [shape: f32[2,4,256], index: 0, kind: input, shape index: {}]   ;;  %s785_s1 = inlined_call_operand.vmem [shape: bf16[8,4], index: 1, kind: input, shape index: {}]   ;;  %s786_s2 = inlined_call_operand.vmem [shape: f32[8,1], index: 2, kind: input, shape index: {}]   ;;  %s787_s3 = inlined_call_operand.hbm [shape: bf16[2,8,256], index: 3, kind: output, shape index: {}]  }
   0x1   :  { %10 = vsyncpa [#allocation3 + $0x1], 0 }
   0x2   :  { %11 = vsyncpa [#allocation4], 0 }
   0x3   :  { %13 = vsyncpa [#allocation4 + $0x1], 0  ;;  %s606_s12 = smov 0   ;;  %s608_s13 = smov 0  }
   0x4   :  { %s610_s14 = smov 0   ;;  %s612_s15 = smov 0  }
   0x5   :  { %s614_s16 = smov 0   ;;  %s616_s17 = smov 0  }
   0x6 LB: > { %s383_s18 = sadd.s32 4294967295, %s581_s17   ;;  %s384_s19 = sadd.s32 4294967294, %s581_s17   ;;  %s581_s17 = sphi %s616_s17, %s19_s17   ;;  %s577_s16 = sphi %s614_s16, %s803_s16   ;;  %s573_s15 = sphi %s612_s15, %s802_s15   ;;  %s569_s14 = sphi %s610_s14, %s801_s14   ;;  %s565_s13 = sphi %s608_s13, %s800_s13   ;;  %s561_s12 = sphi %s606_s12, %s799_s12  }
   0x7   : > { %s31_s20 = sadd.s32 1, %s577_s16  ;;  %s40_s21 = sadd.s32 1, %s569_s14 }
   0x8   : > { %p33_p0 = scmp.ge.s32.totalorder %s31_s20, 2  ;;  %p47_p1 = scmp.ne.s32.totalorder %s569_s14, %s565_s13 }
   0x9   : > { %p48_p2 = scmp.eq.s32.totalorder %s581_s17, 0  ;;  %p53_p3 = scmp.ne.s32.totalorder %s565_s13, %s561_s12 }
   0xa   : > { %s805_s20 = smov (%p33_p0, %s31_s20), 0  ;;  %p54_p5 = scmp.eq.s32.totalorder %s383_s18, 0 }
   0xb   : > { %p647_p4 = por %p48_p2, %p47_p1  ;;  %s35_s23 = ssub.s32 %s577_s16, %s805_s20 }
   0xc   : > { %p121_p6 = scmp.eq.s32.totalorder %s383_s18, 1  ;;  %p38_p7 = scmp.eq.s32.totalorder %s35_s23, 0 }
   0xd   : > { %p653_p8 = por %p54_p5, %p53_p3  ;;  %p127_p10 = scmp.eq.s32.totalorder %s384_s19, 1 }
   0xe   : > { %p657_p9 = por %p121_p6, %p47_p1  ;;  %p416_p13 = scmp.lt.s32.totalorder %s581_s17, 2 }
   0xf   : > { %s662_s26 = scalar_select %p38_p7, %s569_s14, %s40_s21  }
  0x10   : > { %s791_s25 = scalar_select %p657_p9, 1, 0 }
  0x11   : > { %p664_p11 = por %p127_p10, %p53_p3  ;;  %s153_s28 = sand.u32 1, %s569_s14  }
  0x12   : > { %s387_s29 = sshll.u32 %s153_s28, 3  ;;  %s401_s30 = sshll.u32 %s577_s16, 7 }
  0x13   : > { %s792_s27 = scalar_select %p664_p11, 1, 0 }
  0x14   : > { %s675_s6 = scalar_lea.hbm %s784_s0, %s401_s30  ;;  %s157_s7 = scalar_lea.vmem [#allocation2], %s387_s29 }
  0x15   : > { %s167_s8 = sshll.u32 %s157_s7, 4  ;;  %p681_p0 = pnand %p416_p13, %p647_p4  ;;  %s677_s8 = int_to_ptr.vmem [resolvable:$true] %s167_s8 }
  0x16   : > { %s154_s10 = scalar_lea.sflag [#allocation3], %s153_s28  ;;  %s469_s11 = scalar_lea.hbm %s675_s6, 128 }
  0x17   : > { %p470_p3 = scmp.ne.s32.totalorder %s675_s6, %s469_s11  ;;  %p471_p5 = pneg %p681_p0 }
  0x18   : > { %s474_s21 = scalar_lea.hbm %s784_s0, 256  ;;  %p475_p4 = scmp.lt.u32.totalorder %s675_s6, %s784_s0 }
  0x19   : > { %p472_p6 = pnand %p471_p5, %p470_p3  ;;  %p476_p10 = scmp.lt.u32.totalorder %s474_s21, %s469_s11 }
  0x1a   : > { %p478_p12 = scmp.lt.u32.totalorder %s469_s11, %s675_s6 }
  0x1b   : > { %p473_p7 = pneg %p472_p6  ;;  %p477_p13 = por %p476_p10, %p475_p4 }
  0x1d   : > { %p479_p1 = por %p478_p12, %p477_p13 }
  0x1f   : > { %p480_p2 = pnand %p479_p1, %p473_p7 }
  0x21   : > { %483 = shalt.err (!%p480_p2)
}
  0x22   : > { %s484_s28 = scalar_lea.vmem %s677_s8, 128  ;;  %s583_s29 = smov [#allocation2]  }
  0x23   : > { %p485_p3 = scmp.ne.s32.totalorder %s677_s8, %s484_s28  ;;  %s489_s30 = sshll.u32 %s583_s29, 4  ;;  %s490_s30 = int_to_ptr.vmem [resolvable:$false] %s489_s30 }
  0x24   : > { %s491_s4 = scalar_lea.vmem %s490_s30, 256  ;;  %p492_p9 = scmp.lt.s32.totalorder %s677_s8, %s490_s30 }
  0x25   : > { %p487_p6 = pnand %p485_p3, %p471_p5  ;;  %p493_p4 = scmp.lt.s32.totalorder %s491_s4, %s484_s28 }
  0x27   : > { %p488_p11 = pneg %p487_p6  ;;  %p494_p10 = por %p493_p4, %p492_p9 }
  0x29   : > { %p495_p12 = pnand %p494_p10, %p488_p11 }
  0x2b   : > { %498 = shalt.err (!%p495_p12)
}
  0x2c   : > { %411 = dma.hbm_to_vmem [thread:$0]  (!%p681_p0), %s675_s6, 128, %s677_s8, %s154_s10  }
  0x2d   : > { %p794_p1 = scmp.lt.s32.totalorder %s581_s17, 3  ;;  %p795_p2 = scmp.ge.s32.totalorder %s581_s17, 1 }
  0x2f   : > { %p173_p5 = pnand %p795_p2, %p794_p1 }
  0x30   : > { %s717_s5 = sand.u32 (!%p173_p5), 1, %s565_s13  }
  0x31   : > { %176 = sbr.rel (%p173_p5) target bundleno = 297 (0x129), region = 32  ;;  %s391_s7 = sshll.u32 (!%p173_p5), %s717_s5, 3 }
  0x32   : > { %s179_s11 = scalar_lea.sflag (!%p173_p5), [#allocation3], %s717_s5  ;;  %s182_s18 = scalar_lea.vmem (!%p173_p5), [#allocation2], %s391_s7 }
  0x38   : > { %552 = dma.done.wait (%p653_p8), %s179_s11, 128  }
  0x39   : > { %554 = vsyncadd (%p653_p8), %s179_s11, 4294967168  ;;  %v584_v0 = vmov 0   ;;  %v208_v1 = vld [vmem:[%s182_s18] sm:$0xff]  ;;  %vm225_vm0 = vcmask 1041408   ;;  %vm221_vm1 = vcmask 31744   ;;  %s403_s10 = sshll.u32 %s573_s15, 7 }
  0x3a   : > { %264 = vmatprep.mubr.bf16.mxu0 %v584_v0  ;;  %467 = vset.pattern.permute.xlu0 %v584_v0  ;;  %v215_v2 = vld [vmem:[%s786_s2] sm:$0xff]  ;;  %v210_v3 = vcombine.high %v208_v1, %v208_v1  ;;  %v212_v4 = vpack.c.bf16 %v208_v1, %v208_v1  ;;  %s204_s19 = scalar_lea.vmem [#allocation5], %s391_s7  ;;  %s735_s28 = scalar_lea.hbm %s787_s3, %s403_s10 }
  0x3b   : > { %218 = vperm.xlu0 %467, %v215_v2   ;;  %v214_v7 = vld [vmem:[%s785_s1] sm:$0xf]  ;;  %s299_s21 = sshll.u32 %s204_s19, 4  ;;  %s283_s29 = scalar_lea.sflag [#allocation4], %s717_s5  ;;  %s737_s21 = int_to_ptr.vmem [resolvable:$true] %s299_s21 }
  0x3c   : > { %v213_v5 = vpack.c.bf16 %v210_v3, %v210_v3  ;;  %v227_v6 = vsel %vm225_vm0, %v212_v4, 0  ;;  %s499_s30 = scalar_lea.vmem %s737_s21, 128  ;;  %p796_p9 = scmp.ne.s32.totalorder %s791_s25, 0 }
  0x3d   : > { %p500_p8 = scmp.ne.s32.totalorder %s737_s21, %s499_s30  ;;  %s585_s15 = smov [#allocation5]  }
  0x3e   : > { %393 = vmatprep.subr.msk.bf16.mxu0 %vm225_vm0, %v213_v5  ;;  %s503_s4 = sshll.u32 %s585_s15, 4  ;;  %s504_s4 = int_to_ptr.vmem [resolvable:$false] %s503_s4 }
  0x3f   : > { %233 = vmatpush1.bf16.msra.mxu0 %v227_v6  ;;  %p501_p11 = pnand %p500_p8, %p796_p9  ;;  %s505_s7 = scalar_lea.vmem %s504_s4, 256 }
  0x40   : > { %p506_p7 = scmp.lt.s32.totalorder %s737_s21, %s504_s4  ;;  %p507_p13 = scmp.lt.s32.totalorder %s505_s7, %s499_s30 }
  0x41   : > { %p502_p0 = pneg %p501_p11 }
  0x42   : > { %394 = vmatmul.mubr.msk.bf16.vlgmr.msra.gmra.mrb[0].mxu0 %vm221_vm1, %v214_v7  ;;  %p508_p3 = por %p507_p13, %p506_p7 }
  0x44   : > { %p509_p6 = pnand %p508_p3, %p502_p0 }
  0xba   : > { %v219_v8 = vpop.permute.xlu0 %218 }
 0x115   : > { %v266_v9 = vpop.f32.mrb[0].mxu0 }
 0x116   : > { %v267_v10 = vadd.f32 %v266_v9, %v219_v8  ;;  %v268_v11 = vpop.f32.mrb[1].mxu0 }
 0x117   : > { %v269_v12 = vadd.f32 %v268_v11, %v219_v8  ;;  %v270_v13 = vpop.f32.mrb[2].mxu0 }
 0x118   : > { %v271_v14 = vpop.f32.mrb[3].mxu0 }
 0x119   : > { %v402_v15 = vpack.c.bf16 %v269_v12, %v267_v10 }
 0x11b   : > { %281 = vst [vmem:[%s204_s19] sm:$0xff] %v402_v15 }
 0x11c   : > { %512 = shalt.err (!%p509_p6)
}
 0x11d   : > { %s513_s5 = scalar_lea.hbm %s735_s28, 128  ;;  %s517_s6 = scalar_lea.hbm %s787_s3, 256 }
 0x11e   : > { %p514_p4 = scmp.ne.s32.totalorder %s735_s28, %s513_s5  ;;  %p518_p1 = scmp.lt.u32.totalorder %s735_s28, %s787_s3 }
 0x11f   : > { %p519_p2 = scmp.lt.u32.totalorder %s517_s6, %s513_s5  ;;  %p521_p8 = scmp.lt.u32.totalorder %s513_s5, %s735_s28 }
 0x120   : > { %p515_p10 = pnand %p514_p4, %p796_p9 }
 0x121   : > { %p520_p5 = por %p519_p2, %p518_p1 }
 0x122   : > { %p516_p12 = pneg %p515_p10 }
 0x123   : > { %p522_p11 = por %p521_p8, %p520_p5 }
 0x125   : > { %p523_p0 = pnand %p522_p11, %p516_p12 }
 0x127   : > { %526 = shalt.err (!%p523_p0)
}
 0x128   : > { %406 = dma.vmem_to_hbm [thread:$0]  (%p796_p9), %s737_s21, 128, %s735_s28, %s283_s29  }
 0x129 PF: > { %s311_s24 = sand.u32 1, %s561_s12   ;;  %p797_p7 = scmp.ne.s32.totalorder %s792_s27, 0 }
 0x12a   : > { %p798_p13 = scmp.ge.s32.totalorder %s581_s17, 2  ;;  %s312_s10 = scalar_lea.sflag [#allocation4], %s311_s24 }
 0x12c   : > { %p413_p3 = pnand %p798_p13, %p797_p7 }
 0x12e   : > { %556 = dma.done.wait (!%p413_p3), %s312_s10, 128  }
 0x12f   : > { %558 = vsyncadd (!%p413_p3), %s312_s10, 4294967168  ;;  %s19_s17 = sadd.s32 1, %s581_s17   ;;  %s799_s12 = smov %s565_s13 }
 0x130   : > { %p16_p6 = scmp.ge.s32.totalorder %s19_s17, 4   ;;  %s800_s13 = smov %s569_s14 }
 0x131   : > { %s801_s14 = smov %s662_s26  ;;  %s802_s15 = smov %s577_s16 }
 0x132   : > { %s803_s16 = smov %s805_s20  ;;  %18 = sbr.rel (!%p16_p6) target bundleno = 6 (0x6), region = 77 }
 0x139   :  { %317 = vsyncpa [#allocation3], 1 }
 0x13a   :  { %319 = vsyncpa [#allocation3 + $0x1], 1 }
 0x13b   :  { %320 = vsyncpa [#allocation4], 1 }
 0x13c   :  { %322 = vsyncpa [#allocation4 + $0x1], 1 }

</bundles_post_ra>
